<compile_context>
chip_gen: v7x
topology: tpu7x:2x2x1
jax: 0.10.0
libtpu: 0.0.40
codegen_flags: <defaults>
</compile_context>

<pallas_src>
from functools import partial

import jax
import jax.numpy as jnp
from jax.experimental import pallas as pl
from jax.experimental.pallas import tpu as pltpu


_TARGET_IN_BLOCK = 4 * 1024 * 1024      # ~4 MiB input blocks: mem-bound sweet spot on v5e/v6e/v7x
_VMEM_LIMIT = 32 * 1024 * 1024          # headroom; well under every generation's physical VMEM


def _sublane_quantum(itemsize):
    # Minimum second-minor block granularity by dtype width (f32:8, bf16:16, int8/fp8:32).
    return {4: 8, 2: 16, 1: 32}.get(itemsize, 8)


def _pad_to(v, q):
    return -(-v // q) * q


def _plan_tiles(R, L, *, lane_quantum, row_quantum, in_block_bytes,
                target_bytes=_TARGET_IN_BLOCK, min_steps=4):
    """Pick (row_tile, lane_tile) for a (R, ..., L)-shaped problem.

    lane tile: full extent if one row group fits the budget, else the largest quantum multiple
               that does (review item 9: split instead of silently blowing VMEM).
    row tile : largest block under the budget, while keeping >= 4 (and even) grid steps so each
               v7x TensorCore gets >= 2 pipelined blocks (review item 4).  Ragged last blocks are
               fine — correctness does not depend on divisibility (review item 3).
    """
    # --- lane / second-minor tile ---------------------------------------------------------
    if in_block_bytes(1, L) <= target_bytes or L <= lane_quantum:
        l_t = L
    else:
        units = max(1, target_bytes // in_block_bytes(1, lane_quantum))
        l_t = min(units, -(-L // lane_quantum)) * lane_quantum
        if l_t >= L:
            l_t = L
    # --- row tile --------------------------------------------------------------------------
    rows_cap = max(1, target_bytes // in_block_bytes(1, l_t))
    steps = max(min_steps, -(-R // rows_cap))
    if steps % 2:                       # balanced split across v7x's two TensorCores
        steps += 1
    steps = max(1, min(steps, R))
    r_t = -(-R // steps)
    if r_t < R:                         # sublane-aligned so output blocks satisfy the (8,128) rule
        r_t = min(R, _pad_to(r_t, row_quantum))
    return r_t, l_t


# ---------------------------------------------------------------------------------------------
# Kernel bodies (fused single-pass max; no large intermediates)
# ---------------------------------------------------------------------------------------------

def _pool_groups_kernel(x_ref, o_ref, *, G):
    # x_ref: (r_t, G, l_t)   — G = k*k window elements on the (small) second-minor axis.
    # o_ref: (r_t, l_t)      — lane-dense output (l_t = a tile of Wo*C).
    acc = x_ref[:, 0, :]
    for g in range(1, G):
        acc = jnp.maximum(acc, x_ref[:, g, :])
    o_ref[...] = acc


def _pool_nhwc_kernel(x_ref, o_ref, *, k, C):
    # x_ref: (r_t, k, wo_t, k*C) — k input rows per output row; k column-neighbours packed as
    #                              contiguous lane chunks of width C.
    # o_ref: (r_t, wo_t, C)
    acc = x_ref[:, 0, :, 0:C]
    for i in range(k):
        for j in range(k):
            if i == 0 and j == 0:
                continue
            acc = jnp.maximum(acc, x_ref[:, i, :, j * C:(j + 1) * C])
    o_ref[...] = acc


# ---------------------------------------------------------------------------------------------
# pallas_call wrappers
# ---------------------------------------------------------------------------------------------

def _pool_groups(x):
    """x: (R, G, L) -> (R, L), max over the G axis."""
    R, G, L = x.shape
    isz = x.dtype.itemsize
    sub = _sublane_quantum(isz)
    in_bytes = lambda r, l: r * _pad_to(G, sub) * _pad_to(l, 128) * isz
    r_t, l_t = _plan_tiles(R, L, lane_quantum=128, row_quantum=sub, in_block_bytes=in_bytes)
    grid = (pl.cdiv(R, r_t), pl.cdiv(L, l_t))
    return pl.pallas_call(
        partial(_pool_groups_kernel, G=G),
        out_shape=jax.ShapeDtypeStruct((R, L), x.dtype),
        grid=grid,
        in_specs=[pl.BlockSpec((r_t, G, l_t), lambda r, c: (r, 0, c))],
        out_specs=pl.BlockSpec((r_t, l_t), lambda r, c: (r, c)),
        compiler_params=pltpu.CompilerParams(
            dimension_semantics=("parallel", "parallel"),
            vmem_limit_bytes=_VMEM_LIMIT),
    )(x)


def _pool_windows(x, k, C):
    """x: (R, k, Wo, k*C) -> (R, Wo, C), max over the k x k window."""
    R, _, Wo, _ = x.shape
    isz = x.dtype.itemsize
    sub = _sublane_quantum(isz)
    in_bytes = lambda r, w: r * k * _pad_to(w, sub) * _pad_to(k * C, 128) * isz
    r_t, wo_t = _plan_tiles(R, Wo, lane_quantum=sub, row_quantum=sub, in_block_bytes=in_bytes)
    grid = (pl.cdiv(R, r_t), pl.cdiv(Wo, wo_t))
    return pl.pallas_call(
        partial(_pool_nhwc_kernel, k=k, C=C),
        out_shape=jax.ShapeDtypeStruct((R, Wo, C), x.dtype),
        grid=grid,
        in_specs=[pl.BlockSpec((r_t, k, wo_t, k * C), lambda r, w: (r, 0, w, 0))],
        out_specs=pl.BlockSpec((r_t, wo_t, C), lambda r, w: (r, w, 0)),
        compiler_params=pltpu.CompilerParams(
            dimension_semantics=("parallel", "parallel"),
            vmem_limit_bytes=_VMEM_LIMIT),
    )(x)


def maxpool2d_pallas(x_nchw, k=2):
    """nn.MaxPool2d(kernel_size=k, stride=k) forward: (N, C, H, W) -> (N, C, H//k, W//k)."""
    N, C, H, W = x_nchw.shape
    Ho, Wo = H // k, W // k
    assert Ho > 0 and Wo > 0, "spatial dims smaller than the pooling window"

    # PyTorch floor behaviour: drop trailing rows/cols that do not fill a window.
    x = x_nchw[:, :, :Ho * k, :Wo * k]

    # One XLA relayout: (N,C,Ho,kh,Wo,kw) -> (N,Ho,kh,kw,Wo,C).  Everything else is a free
    # row-major reshape.  The resulting (N*Ho, k*k, Wo*C) view gives the kernel lane-dense
    # loads/stores for any C and a reduction over the tiny k*k second-minor axis only.
    x = jnp.transpose(x.reshape(N, C, Ho, k, Wo, k), (0, 2, 3, 5, 4, 1))
    x = x.reshape(N * Ho, k * k, Wo * C)

    out = _pool_groups(x)                                   # (N*Ho, Wo*C)
    return jnp.transpose(out.reshape(N, Ho, Wo, C), (0, 3, 1, 2))


def maxpool2d_pallas_nhwc(x_nhwc, k=2):
    """Transpose-free channels-last variant: (N, H, W, C) -> (N, H//k, W//k, C).

    For graphs that already run NHWC, this entry point performs the pooling with zero XLA
    relayouts (only free row-major reshapes), removing the ~2.5-3x extra HBM traffic the
    NCHW round-trip costs (review item 1)."""
    N, H, W, C = x_nhwc.shape
    Ho, Wo = H // k, W // k
    assert Ho > 0 and Wo > 0, "spatial dims smaller than the pooling window"
    x = x_nhwc[:, :Ho * k, :Wo * k, :].reshape(N * Ho, k, Wo, k * C)   # free reshape
    return _pool_windows(x, k, C).reshape(N, Ho, Wo, C)


if __name__ == "__main__":
    key = jax.random.PRNGKey(0)
    N, C, H, W = 2, 4, 16, 16
    k = 2
    x = jax.random.normal(key, (N, C, H, W), jnp.float32)

    # Pure-JAX reference (identical max / floor / NaN semantics to nn.MaxPool2d).
    ref = jax.lax.reduce_window(
        x, -jnp.inf, jax.lax.max,
        window_dimensions=(1, 1, k, k), window_strides=(1, 1, k, k), padding="VALID")

    # Module-faithful NCHW path.
    out = jax.block_until_ready(maxpool2d_pallas(x, k=k))
    assert out.shape == (N, C, H // k, W // k) and out.dtype == x.dtype
    if not bool(jnp.allclose(out, ref)):
        max_err = float(jnp.max(jnp.abs(out - ref)))
        raise AssertionError(f"NCHW Pallas output mismatch vs reference, max_abs_err={max_err}")

    # Transpose-free channels-last path.
    x_nhwc = jnp.transpose(x, (0, 2, 3, 1))
    out_nhwc = jax.block_until_ready(maxpool2d_pallas_nhwc(x_nhwc, k=k))
    ref_nhwc = jnp.transpose(ref, (0, 2, 3, 1))
    if not bool(jnp.allclose(out_nhwc, ref_nhwc)):
        max_err = float(jnp.max(jnp.abs(out_nhwc - ref_nhwc)))
        raise AssertionError(f"NHWC Pallas output mismatch vs reference, max_abs_err={max_err}")

    print("KERNEL_OK")
</pallas_src>

<mosaic_0001>
module attributes {stable_mosaic.version = 11 : i64} {
  func.func @_pool_groups_kernel(%arg0: i32, %arg1: i32, %arg2: memref<8x4x32xf32, #tpu.memory_space<vmem>>, %arg3: memref<8x32xf32, #tpu.memory_space<vmem>>) attributes {dimension_semantics = [#tpu.dimension_semantics<parallel>, #tpu.dimension_semantics<parallel>], iteration_bounds = array<i64: 2, 1>, scalar_prefetch = 0 : i64, scratch_operands = 0 : i64, tpu.core_type = #tpu.core_type<tc>, window_params = [{transform_indices = @transform_0, window_bounds = array<i64: 8, 4, 32>}, {transform_indices = @transform_1, window_bounds = array<i64: 8, 32>}]} {
    %c0 = arith.constant 0 : index
    %c0_0 = arith.constant 0 : index
    %c0_1 = arith.constant 0 : index
    %0 = vector.load %arg2[%c0, %c0_0, %c0_1] : memref<8x4x32xf32, #tpu.memory_space<vmem>>, vector<8x1x32xf32>
    %1 = vector.shape_cast %0 : vector<8x1x32xf32> to vector<8x32xf32>
    %c0_2 = arith.constant 0 : index
    %c1 = arith.constant 1 : index
    %c0_3 = arith.constant 0 : index
    %2 = vector.load %arg2[%c0_2, %c1, %c0_3] : memref<8x4x32xf32, #tpu.memory_space<vmem>>, vector<8x1x32xf32>
    %3 = vector.shape_cast %2 : vector<8x1x32xf32> to vector<8x32xf32>
    %4 = arith.maximumf %1, %3 : vector<8x32xf32>
    %c0_4 = arith.constant 0 : index
    %c2 = arith.constant 2 : index
    %c0_5 = arith.constant 0 : index
    %5 = vector.load %arg2[%c0_4, %c2, %c0_5] : memref<8x4x32xf32, #tpu.memory_space<vmem>>, vector<8x1x32xf32>
    %6 = vector.shape_cast %5 : vector<8x1x32xf32> to vector<8x32xf32>
    %7 = arith.maximumf %4, %6 : vector<8x32xf32>
    %c0_6 = arith.constant 0 : index
    %c3 = arith.constant 3 : index
    %c0_7 = arith.constant 0 : index
    %8 = vector.load %arg2[%c0_6, %c3, %c0_7] : memref<8x4x32xf32, #tpu.memory_space<vmem>>, vector<8x1x32xf32>
    %9 = vector.shape_cast %8 : vector<8x1x32xf32> to vector<8x32xf32>
    %10 = arith.maximumf %7, %9 : vector<8x32xf32>
    %c0_8 = arith.constant 0 : index
    %c0_9 = arith.constant 0 : index
    %11 = vector.load %arg3[%c0_8, %c0_9] : memref<8x32xf32, #tpu.memory_space<vmem>>, vector<8x32xf32>
    tpu.vector_store %arg3[%c0_8, %c0_9], %10 {strides = array<i32>} : memref<8x32xf32, #tpu.memory_space<vmem>>, vector<8x32xf32>,
    return
  }
  func.func @transform_0(%arg0: i32, %arg1: i32) -> (i32, i32, i32) {
    %c0_i32 = arith.constant 0 : i32
    %c0_i32_0 = arith.constant 0 : i32
    return %arg0, %c0_i32, %arg1 : i32, i32, i32
  }
  func.func @transform_1(%arg0: i32, %arg1: i32) -> (i32, i32) {
    %c0_i32 = arith.constant 0 : i32
    return %arg0, %arg1 : i32, i32
  }
}

</mosaic_0001>

<bundles_post_ra>
// kernel: tpu_custom_call.1
= control target key start
LH: loop header
LB: loop body
LE: loop exit
PB: predicated region body
PF: predicated region fallthrough
CT: control target
= control target key end

     0   :  { %6 = vsyncpa [#allocation3], 0  ;;  %s755_s0 = inlined_call_operand.hbm [shape: f32[16,4,32], index: 0, kind: input, shape index: {}]   ;;  %s756_s1 = inlined_call_operand.hbm [shape: f32[16,32], index: 1, kind: output, shape index: {}]  }
   0x1   :  { %8 = vsyncpa [#allocation3 + $0x1], 0 }
   0x2   :  { %9 = vsyncpa [#allocation4], 0 }
   0x3   :  { %11 = vsyncpa [#allocation4 + $0x1], 0  ;;  %s544_s6 = smov 0   ;;  %s546_s7 = smov 0  }
   0x4   :  { %s548_s8 = smov 0   ;;  %s550_s9 = smov 0  }
   0x5   :  { %s552_s10 = smov 0   ;;  %s554_s11 = smov 0  }
   0x6 LB: > { %s337_s12 = sadd.s32 4294967295, %s528_s11   ;;  %s338_s13 = sadd.s32 4294967294, %s528_s11   ;;  %s528_s11 = sphi %s554_s11, %s17_s11   ;;  %s524_s10 = sphi %s552_s10, %s771_s10   ;;  %s520_s9 = sphi %s550_s9, %s770_s9   ;;  %s516_s8 = sphi %s548_s8, %s769_s8   ;;  %s512_s7 = sphi %s546_s7, %s768_s7   ;;  %s508_s6 = sphi %s544_s6, %s767_s6  }
   0x7   : > { %s29_s14 = sadd.s32 1, %s524_s10  ;;  %s38_s15 = sadd.s32 1, %s516_s8 }
   0x8   : > { %p31_p0 = scmp.ge.s32.totalorder %s29_s14, 2  ;;  %p45_p1 = scmp.ne.s32.totalorder %s516_s8, %s512_s7 }
   0x9   : > { %p46_p2 = scmp.eq.s32.totalorder %s528_s11, 0  ;;  %p51_p3 = scmp.ne.s32.totalorder %s512_s7, %s508_s6 }
   0xa   : > { %s773_s14 = smov (%p31_p0, %s29_s14), 0  ;;  %p52_p5 = scmp.eq.s32.totalorder %s337_s12, 0 }
   0xb   : > { %p585_p4 = por %p46_p2, %p45_p1  ;;  %s33_s17 = ssub.s32 %s524_s10, %s773_s14 }
   0xc   : > { %p77_p6 = scmp.eq.s32.totalorder %s337_s12, 1  ;;  %p36_p7 = scmp.eq.s32.totalorder %s33_s17, 0 }
   0xd   : > { %p591_p8 = por %p52_p5, %p51_p3  ;;  %p83_p10 = scmp.eq.s32.totalorder %s338_s13, 1 }
   0xe   : > { %p595_p9 = por %p77_p6, %p45_p1  ;;  %p364_p13 = scmp.lt.s32.totalorder %s528_s11, 2 }
   0xf   : > { %s600_s20 = scalar_select %p36_p7, %s516_s8, %s38_s15  }
  0x10   : > { %s760_s19 = scalar_select %p595_p9, 1, 0 }
  0x11   : > { %p602_p11 = por %p83_p10, %p51_p3  ;;  %s103_s22 = sand.u32 1, %s516_s8  }
  0x12   : > { %s341_s23 = sshll.u32 %s103_s22, 5  ;;  %s351_s24 = sshll.u32 %s524_s10, 9 }
  0x13   : > { %s761_s21 = scalar_select %p602_p11, 1, 0 }
  0x14   : > { %s613_s27 = scalar_lea.hbm %s755_s0, %s351_s24  ;;  %s107_s28 = scalar_lea.vmem [#allocation2], %s341_s23 }
  0x15   : > { %s115_s29 = sshll.u32 %s107_s28, 4  ;;  %p619_p0 = pnand %p364_p13, %p585_p4  ;;  %s615_s29 = int_to_ptr.vmem [resolvable:$true] %s115_s29 }
  0x16   : > { %s624_s2 = scalar_lea.sflag [#allocation3], %s103_s22  ;;  %s416_s3 = scalar_lea.hbm %s613_s27, 512 }
  0x17   : > { %p417_p2 = scmp.ne.s32.totalorder %s613_s27, %s416_s3  ;;  %p418_p3 = pneg %p619_p0 }
  0x18   : > { %s421_s12 = scalar_lea.hbm %s755_s0, 1024  ;;  %p422_p4 = scmp.lt.u32.totalorder %s613_s27, %s755_s0 }
  0x19   : > { %p419_p5 = pnand %p418_p3, %p417_p2  ;;  %p423_p7 = scmp.lt.u32.totalorder %s421_s12, %s416_s3 }
  0x1a   : > { %p425_p13 = scmp.lt.u32.totalorder %s416_s3, %s613_s27 }
  0x1b   : > { %p420_p6 = pneg %p419_p5  ;;  %p424_p10 = por %p423_p7, %p422_p4 }
  0x1d   : > { %p426_p12 = por %p425_p13, %p424_p10 }
  0x1f   : > { %p427_p1 = pnand %p426_p12, %p420_p6 }
  0x21   : > { %430 = shalt.err (!%p427_p1)
}
  0x22   : > { %s431_s16 = scalar_lea.vmem %s615_s29, 512  ;;  %s530_s17 = smov [#allocation2]  }
  0x23   : > { %p432_p2 = scmp.ne.s32.totalorder %s615_s29, %s431_s16  ;;  %s436_s22 = sshll.u32 %s530_s17, 4  ;;  %s437_s22 = int_to_ptr.vmem [resolvable:$false] %s436_s22 }
  0x24   : > { %s438_s23 = scalar_lea.vmem %s437_s22, 1024  ;;  %p439_p9 = scmp.lt.s32.totalorder %s615_s29, %s437_s22 }
  0x25   : > { %p434_p5 = pnand %p432_p2, %p418_p3  ;;  %p440_p4 = scmp.lt.s32.totalorder %s438_s23, %s431_s16 }
  0x27   : > { %p435_p11 = pneg %p434_p5  ;;  %p441_p7 = por %p440_p4, %p439_p9 }
  0x29   : > { %p442_p10 = pnand %p441_p7, %p435_p11 }
  0x2b   : > { %445 = shalt.err (!%p442_p10)
}
  0x2c   : > { %s531_s24 = smov 64   ;;  %s532_s25 = smov 4  }
  0x2d   : > { %359 = dma.hbm_to_vmem [thread:$0]  (!%p619_p0), %s613_s27, 512, %s615_s29, %s624_s2, %s531_s24, %s531_s24, %s532_s25  }
  0x2e   : > { %p123_p12 = scmp.lt.s32.totalorder %s528_s11, 3  ;;  %p763_p1 = scmp.ge.s32.totalorder %s528_s11, 1 }
  0x30   : > { %p124_p3 = pnand %p763_p1, %p123_p12 }
  0x31   : > { %s656_s26 = sand.u32 (!%p124_p3), 1, %s512_s7  }
  0x32   : > { %127 = sbr.rel (%p124_p3) target bundleno = 95 (0x5f), region = 24  ;;  %s345_s28 = sshll.u32 (!%p124_p3), %s656_s26, 5 }
  0x33   : > { %s130_s3 = scalar_lea.sflag (!%p124_p3), [#allocation3], %s656_s26  ;;  %s660_s4 = scalar_lea.vmem (!%p124_p3), [#allocation2], %s345_s28 }
  0x39   : > { %499 = dma.done.wait (%p591_p8), %s130_s3, 512  }
  0x3a   : > { %501 = vsyncadd (%p591_p8), %s130_s3, 4294966784  ;;  %s346_s27 = sshll.u32 %s656_s26, 3  ;;  %v153_v0 = vld [vmem:[%s660_s4] sm:$0x1]  ;;  %v154_v1 = vld [vmem:[%s660_s4 + $0x4] sm:$0x1] }
  0x3b   : > { %v155_v2 = vld [vmem:[%s660_s4 + $0x8] sm:$0x1]  ;;  %v156_v3 = vld [vmem:[%s660_s4 + $0xc] sm:$0x1]  ;;  %v157_v4 = vld [vmem:[%s660_s4 + $0x10] sm:$0x1] }
  0x3c   : > { %v158_v5 = vld [vmem:[%s660_s4 + $0x14] sm:$0x1]  ;;  %v159_v6 = vld [vmem:[%s660_s4 + $0x18] sm:$0x1]  ;;  %v160_v7 = vld [vmem:[%s660_s4 + $0x1c] sm:$0x1] }
  0x3d   : > { %v161_v8 = vld [vmem:[%s660_s4 + $0x1] sm:$0x1]  ;;  %vm218_vm0 = vcmask 1041409   ;;  %v162_v9 = vld [vmem:[%s660_s4 + $0x5] sm:$0x1]  ;;  %vm221_vm1 = vcmask 1042434  }
  0x3e   : > { %v163_v10 = vld [vmem:[%s660_s4 + $0x9] sm:$0x1]  ;;  %v164_v11 = vld [vmem:[%s660_s4 + $0xd] sm:$0x1]  ;;  %v169_v12 = vmax.f32 %v153_v0, %v161_v8  ;;  %v165_v13 = vld [vmem:[%s660_s4 + $0x11] sm:$0x1]  ;;  %v170_v16 = vmax.f32 %v154_v1, %v162_v9 }
  0x3f   : > { %v166_v14 = vld [vmem:[%s660_s4 + $0x15] sm:$0x1]  ;;  %v167_v15 = vld [vmem:[%s660_s4 + $0x19] sm:$0x1]  ;;  %v171_v17 = vmax.f32 %v155_v2, %v163_v10  ;;  %v172_v18 = vmax.f32 %v156_v3, %v164_v11  ;;  %v168_v19 = vld [vmem:[%s660_s4 + $0x1d] sm:$0x1]  ;;  %v173_v20 = vmax.f32 %v157_v4, %v165_v13 }
  0x40   : > { %v174_v21 = vmax.f32 %v158_v5, %v166_v14  ;;  %v175_v22 = vmax.f32 %v159_v6, %v167_v15  ;;  %v177_v23 = vld [vmem:[%s660_s4 + $0x2] sm:$0x1]  ;;  %v178_v24 = vld [vmem:[%s660_s4 + $0x6] sm:$0x1]  ;;  %v176_v25 = vmax.f32 %v160_v7, %v168_v19  ;;  %v179_v26 = vld [vmem:[%s660_s4 + $0xa] sm:$0x1] }
  0x41   : > { %v180_v27 = vld [vmem:[%s660_s4 + $0xe] sm:$0x1]  ;;  %v181_v28 = vld [vmem:[%s660_s4 + $0x12] sm:$0x1]  ;;  %v185_v29 = vmax.f32 %v169_v12, %v177_v23  ;;  %v186_v30 = vmax.f32 %v170_v16, %v178_v24  ;;  %v182_v31 = vld [vmem:[%s660_s4 + $0x16] sm:$0x1]  ;;  %v187_v34 = vmax.f32 %v171_v17, %v179_v26 }
  0x42   : > { %v183_v32 = vld [vmem:[%s660_s4 + $0x1a] sm:$0x1]  ;;  %v184_v33 = vld [vmem:[%s660_s4 + $0x1e] sm:$0x1]  ;;  %v188_v35 = vmax.f32 %v172_v18, %v180_v27  ;;  %v189_v36 = vmax.f32 %v173_v20, %v181_v28  ;;  %v190_v37 = vmax.f32 %v174_v21, %v182_v31  ;;  %v193_v40 = vld [vmem:[%s660_s4 + $0x3] sm:$0x1] }
  0x43   : > { %v191_v38 = vmax.f32 %v175_v22, %v183_v32  ;;  %v192_v39 = vmax.f32 %v176_v25, %v184_v33  ;;  %v194_v41 = vld [vmem:[%s660_s4 + $0x7] sm:$0x1]  ;;  %v195_v42 = vld [vmem:[%s660_s4 + $0xb] sm:$0x1]  ;;  %v196_v43 = vld [vmem:[%s660_s4 + $0xf] sm:$0x1]  ;;  %v201_v46 = vmax.f32 %v185_v29, %v193_v40 }
  0x44   : > { %v197_v44 = vld [vmem:[%s660_s4 + $0x13] sm:$0x1]  ;;  %v198_v45 = vld [vmem:[%s660_s4 + $0x17] sm:$0x1]  ;;  %v202_v47 = vmax.f32 %v186_v30, %v194_v41  ;;  %v203_v48 = vmax.f32 %v187_v34, %v195_v42  ;;  %v199_v49 = vld [vmem:[%s660_s4 + $0x1b] sm:$0x1]  ;;  %v204_v51 = vmax.f32 %v188_v35, %v196_v43 }
  0x45   : > { %v200_v50 = vld [vmem:[%s660_s4 + $0x1f] sm:$0x1]  ;;  %v205_v52 = vmax.f32 %v189_v36, %v197_v44  ;;  %v206_v53 = vmax.f32 %v190_v37, %v198_v45  ;;  %v207_v54 = vmax.f32 %v191_v38, %v199_v49  ;;  %vm224_vm2 = vcmask 1043459   ;;  %s151_s18 = scalar_lea.vmem [#allocation5], %s346_s27  ;;  %s348_s30 = sshll.u32 %s520_s9, 7 }
  0x46   : > { %v208_v55 = vmax.f32 %v192_v39, %v200_v50  ;;  %v217_v56 = vrot.slane %v202_v47, 7  ;;  %v220_v57 = vrot.slane %v203_v48, 6  ;;  %v223_v58 = vrot.slane %v204_v51, 5  ;;  %s256_s29 = sshll.u32 %s151_s18, 4  ;;  %s708_s12 = scalar_lea.hbm %s756_s1, %s348_s30  ;;  %s703_s29 = int_to_ptr.vmem [resolvable:$true] %s256_s29 }
  0x47   : > { %v226_v59 = vrot.slane %v205_v52, 4  ;;  %vm227_vm3 = vcmask 1044484   ;;  %v229_v61 = vrot.slane %v206_v53, 3  ;;  %vm230_vm4 = vcmask 1045509   ;;  %s242_s13 = scalar_lea.sflag [#allocation4], %s656_s26  ;;  %s446_s15 = scalar_lea.vmem %s703_s29, 128 }
  0x48   : > { %v219_v60 = vsel %vm218_vm0, %v217_v56, %v201_v46  ;;  %v232_v63 = vrot.slane %v207_v54, 2  ;;  %vm233_vm5 = vcmask 1046534   ;;  %v235_v1 = vrot.slane %v208_v55, 1  ;;  %p447_p8 = scmp.ne.s32.totalorder %s703_s29, %s446_s15  ;;  %p764_p9 = scmp.ne.s32.totalorder %s760_s19, 0 }
  0x49   : > { %v222_v62 = vsel %vm221_vm1, %v220_v57, %v219_v60  ;;  %vm236_vm6 = vcmask 1047559   ;;  %vm239_vm7 = vcmask 261120   ;;  %s533_s9 = smov [#allocation5]  }
  0x4a   : > { %v225_v0 = vsel %vm224_vm2, %v223_v58, %v222_v62  ;;  %p448_p11 = pnand %p447_p8, %p764_p9  ;;  %s450_s16 = sshll.u32 %s533_s9, 4  ;;  %s451_s16 = int_to_ptr.vmem [resolvable:$false] %s450_s16 }
  0x4b   : > { %v228_v2 = vsel %vm227_vm3, %v226_v59, %v225_v0  ;;  %s452_s17 = scalar_lea.vmem %s451_s16, 256  ;;  %p453_p6 = scmp.lt.s32.totalorder %s703_s29, %s451_s16 }
  0x4c   : > { %v231_v3 = vsel %vm230_vm4, %v229_v61, %v228_v2  ;;  %p449_p0 = pneg %p448_p11  ;;  %p454_p13 = scmp.lt.s32.totalorder %s452_s17, %s446_s15 }
  0x4d   : > { %v234_v4 = vsel %vm233_vm5, %v232_v63, %v231_v3 }
  0x4e   : > { %v237_v5 = vsel %vm236_vm6, %v235_v1, %v234_v4  ;;  %p455_p2 = por %p454_p13, %p453_p6 }
  0x4f   : > { %240 = vst.msk [vmem:[%s151_s18] sm:$0xff] %vm239_vm7, %v237_v5 }
  0x50   : > { %p456_p5 = pnand %p455_p2, %p449_p0 }
  0x52   : > { %459 = shalt.err (!%p456_p5)
}
  0x53   : > { %s460_s22 = scalar_lea.hbm %s708_s12, 128  ;;  %s464_s25 = scalar_lea.hbm %s756_s1, 256 }
  0x54   : > { %p461_p4 = scmp.ne.s32.totalorder %s708_s12, %s460_s22  ;;  %p465_p12 = scmp.lt.u32.totalorder %s708_s12, %s756_s1 }
  0x55   : > { %p466_p1 = scmp.lt.u32.totalorder %s464_s25, %s460_s22  ;;  %p468_p8 = scmp.lt.u32.totalorder %s460_s22, %s708_s12 }
  0x56   : > { %p462_p7 = pnand %p461_p4, %p764_p9 }
  0x57   : > { %p467_p3 = por %p466_p1, %p465_p12 }
  0x58   : > { %p463_p10 = pneg %p462_p7 }
  0x59   : > { %p469_p11 = por %p468_p8, %p467_p3 }
  0x5b   : > { %p470_p0 = pnand %p469_p11, %p463_p10 }
  0x5d   : > { %473 = shalt.err (!%p470_p0)
}
  0x5e   : > { %354 = dma.vmem_to_hbm [thread:$0]  (%p764_p9), %s703_s29, 128, %s708_s12, %s242_s13  }
  0x5f PF: > { %s268_s3 = sand.u32 1, %s508_s6   ;;  %p765_p6 = scmp.ne.s32.totalorder %s761_s21, 0 }
  0x60   : > { %p766_p13 = scmp.ge.s32.totalorder %s528_s11, 2  ;;  %s269_s4 = scalar_lea.sflag [#allocation4], %s268_s3 }
  0x62   : > { %p361_p2 = pnand %p766_p13, %p765_p6 }
  0x64   : > { %503 = dma.done.wait (!%p361_p2), %s269_s4, 128  }
  0x65   : > { %505 = vsyncadd (!%p361_p2), %s269_s4, 4294967168  ;;  %s17_s11 = sadd.s32 1, %s528_s11   ;;  %s767_s6 = smov %s512_s7 }
  0x66   : > { %p14_p5 = scmp.ge.s32.totalorder %s17_s11, 4   ;;  %s768_s7 = smov %s516_s8 }
  0x67   : > { %s769_s8 = smov %s600_s20  ;;  %s770_s9 = smov %s524_s10 }
  0x68   : > { %s771_s10 = smov %s773_s14  ;;  %16 = sbr.rel (!%p14_p5) target bundleno = 6 (0x6), region = 69 }
  0x6f   :  { %274 = vsyncpa [#allocation3], 1 }
  0x70   :  { %276 = vsyncpa [#allocation3 + $0x1], 1 }
  0x71   :  { %277 = vsyncpa [#allocation4], 1 }
  0x72   :  { %279 = vsyncpa [#allocation4 + $0x1], 1 }

</bundles_post_ra>
